<compile_context>
chip_gen: v6e
topology: v6e:2x2x1
jax: 0.10.0
libtpu: 0.0.40
codegen_flags: <defaults>
</compile_context>

<pallas_src>
import jax
import jax.numpy as jnp
from jax.experimental import pallas as pl
from jax.experimental.pallas import tpu as pltpu


def _wmse_kernel(x_ref, t_ref, o_ref):
    """x_ref, t_ref: [T, TILE_N] lane-dense blocks. o_ref: [1, 1, 128] partial sum."""
    j = pl.program_id(1)

    @pl.when(j == 0)
    def _init():
        o_ref[...] = jnp.zeros_like(o_ref)

    x = x_ref[...].astype(jnp.float32)
    t = t_ref[...].astype(jnp.float32)

    # Original row r of the [N, T] problem is lane r here; its rr target sits
    # in sublane 0. One weight per lane, broadcast over the T sublanes.
    rr = t[0:1, :]                                        # [1, TILE_N]
    in_range = (rr >= 0.0) & (rr < 1.0)
    w = jnp.where(in_range, jnp.floor(rr * 10.0) + 1.0, 0.0)

    d = x - t
    # Scalar partial sum for this tile, accumulated (broadcast) into the
    # chunk's resident 128-lane output block; wrapper reads lane 0.
    o_ref[...] += jnp.sum(d * d * w)


def weighted_mse_loss(inputs, targets, *, num_chunks=2,
                      max_block_bytes=2 * 1024 * 1024):
    """Pallas implementation of WeightedMSELoss.forward(inputs, targets) -> scalar."""
    assert inputs.shape == targets.shape and inputs.ndim == 2
    n, t = inputs.shape

    # Lane-dense layout: batch (N) on the 128-wide lane axis.
    x = jnp.transpose(inputs)                             # [T, N]
    tg = jnp.transpose(targets)                           # [T, N]

    # Tile sizing: largest lane-dense block under max_block_bytes (f32 math),
    # rounded to the 128-lane granule; pad N with zeros so the grid divides
    # evenly (zero-padded columns have diff == 0 so they contribute nothing).
    lane = 128
    max_tile = max(lane, (max_block_bytes // (t * 4)) // lane * lane)
    cols_per_chunk = pl.cdiv(n, num_chunks)
    tile_n = min(max_tile, pl.cdiv(cols_per_chunk, lane) * lane)
    steps = pl.cdiv(cols_per_chunk, tile_n)
    n_pad = num_chunks * steps * tile_n
    if n_pad != n:
        pad = ((0, 0), (0, n_pad - n))
        x = jnp.pad(x, pad)
        tg = jnp.pad(tg, pad)

    itemsize = jnp.dtype(inputs.dtype).itemsize
    cost = pl.CostEstimate(
        flops=8 * n * t,
        transcendentals=0,
        bytes_accessed=2 * n * t * itemsize + num_chunks * 128 * 4,
    )

    partial = pl.pallas_call(
        _wmse_kernel,
        out_shape=jax.ShapeDtypeStruct((num_chunks, 1, 128), jnp.float32),
        grid=(num_chunks, steps),
        in_specs=[
            pl.BlockSpec((t, tile_n), lambda i, j: (0, i * steps + j)),
            pl.BlockSpec((t, tile_n), lambda i, j: (0, i * steps + j)),
        ],
        out_specs=pl.BlockSpec((1, 1, 128), lambda i, j: (i, 0, 0)),
        compiler_params=pltpu.CompilerParams(
            dimension_semantics=("parallel", "arbitrary"),
            vmem_limit_bytes=32 * 1024 * 1024,
        ),
        cost_estimate=cost,
    )(x, tg)

    # Every lane of a chunk's output block holds that chunk's partial sum.
    total = jnp.sum(partial[:, 0, 0])
    # Exact divisor from Python ints (avoids f32 precision loss for huge N*T).
    return total * (1.0 / (n * t))


# Pure-JAX reference mirroring the PyTorch interval-compare semantics.
_WEIGHT_INTERVALS = [
    (0.0, 0.1, 1.0), (0.1, 0.2, 2.0), (0.2, 0.3, 3.0), (0.3, 0.4, 4.0),
    (0.4, 0.5, 5.0), (0.5, 0.6, 6.0), (0.6, 0.7, 7.0), (0.7, 0.8, 8.0),
    (0.8, 0.9, 9.0), (0.9, 1.0, 10.0),
]


def _reference(inputs, targets):
    rr = targets[:, 0:1]
    w = jnp.zeros_like(rr)
    for lower, upper, weight in _WEIGHT_INTERVALS:
        w = jnp.where((rr >= lower) & (rr < upper), jnp.float32(weight), w)
    return jnp.mean((inputs - targets) ** 2 * w)


if __name__ == "__main__":
    key = jax.random.PRNGKey(0)
    k1, k2 = jax.random.split(key)
    N, T = 8, 4  # batch=8, 4 regression targets (targets[:, 0] is the "rr" target)
    inputs = jax.random.uniform(k1, (N, T), dtype=jnp.float32)
    # Include some rr values outside [0, 1) to exercise the weight-0 path.
    targets = jax.random.uniform(k2, (N, T), dtype=jnp.float32,
                                 minval=-0.05, maxval=1.1)

    loss = jax.block_until_ready(weighted_mse_loss(inputs, targets))
    ref = jax.block_until_ready(_reference(inputs, targets))

    assert jnp.allclose(loss, ref, rtol=1e-5, atol=1e-6), (loss, ref)
    print("KERNEL_OK")
</pallas_src>

<mosaic_0001>
module attributes {stable_mosaic.version = 11 : i64} {
  func.func @_wmse_kernel(%arg0: i32, %arg1: i32, %arg2: memref<4x128xf32, #tpu.memory_space<vmem>>, %arg3: memref<4x128xf32, #tpu.memory_space<vmem>>, %arg4: memref<1x1x128xf32, #tpu.memory_space<vmem>>) attributes {dimension_semantics = [#tpu.dimension_semantics<parallel>, #tpu.dimension_semantics<arbitrary>], iteration_bounds = array<i64: 2, 1>, scalar_prefetch = 0 : i64, scratch_operands = 0 : i64, tpu.core_type = #tpu.core_type<tc>, window_params = [{transform_indices = @transform_0, window_bounds = array<i64: 4, 128>}, {transform_indices = @transform_1, window_bounds = array<i64: 4, 128>}, {transform_indices = @transform_2, window_bounds = array<i64: 1, 1, 128>}]} {
    %c0_i32 = arith.constant 0 : i32
    %0 = arith.cmpi eq, %arg1, %c0_i32 : i32
    %1 = arith.extui %0 : i1 to i32
    %c0_i32_0 = arith.constant 0 : i32
    %2 = arith.cmpi ne, %1, %c0_i32_0 : i32
    scf.if %2 {
      %cst_15 = arith.constant 0.000000e+00 : f32
      %30 = vector.broadcast %cst_15 : f32 to vector<1x1x128xf32>
      %c0_16 = arith.constant 0 : index
      %c0_17 = arith.constant 0 : index
      %c0_18 = arith.constant 0 : index
      %31 = vector.load %arg4[%c0_16, %c0_17, %c0_18] : memref<1x1x128xf32, #tpu.memory_space<vmem>>, vector<1x1x128xf32>
      tpu.vector_store %arg4[%c0_16, %c0_17, %c0_18], %30 {strides = array<i32>} : memref<1x1x128xf32, #tpu.memory_space<vmem>>, vector<1x1x128xf32>,
    } else {
    }
    %c0 = arith.constant 0 : index
    %c0_1 = arith.constant 0 : index
    %3 = vector.load %arg2[%c0, %c0_1] : memref<4x128xf32, #tpu.memory_space<vmem>>, vector<4x128xf32>
    %c0_2 = arith.constant 0 : index
    %c0_3 = arith.constant 0 : index
    %4 = vector.load %arg3[%c0_2, %c0_3] : memref<4x128xf32, #tpu.memory_space<vmem>>, vector<4x128xf32>
    %5 = vector.extract_strided_slice %4 {offsets = [0, 0], sizes = [1, 128], strides = [1, 1]} : vector<4x128xf32> to vector<1x128xf32>
    %cst = arith.constant 0.000000e+00 : f32
    %6 = vector.broadcast %cst : f32 to vector<1x128xf32>
    %7 = arith.cmpf oge, %5, %6 : vector<1x128xf32>
    %cst_4 = arith.constant 1.000000e+00 : f32
    %8 = vector.broadcast %cst_4 : f32 to vector<1x128xf32>
    %9 = arith.cmpf olt, %5, %8 : vector<1x128xf32>
    %10 = arith.andi %7, %9 : vector<1x128xi1>
    %cst_5 = arith.constant 1.000000e+01 : f32
    %11 = vector.broadcast %cst_5 : f32 to vector<1x128xf32>
    %12 = arith.mulf %5, %11 : vector<1x128xf32>
    %13 = math.floor %12 : vector<1x128xf32>
    %cst_6 = arith.constant 1.000000e+00 : f32
    %14 = vector.broadcast %cst_6 : f32 to vector<1x128xf32>
    %15 = arith.addf %13, %14 : vector<1x128xf32>
    %cst_7 = arith.constant 0.000000e+00 : f32
    %16 = vector.broadcast %cst_7 : f32 to vector<1x128xf32>
    %17 = arith.select %10, %15, %16 : vector<1x128xi1>, vector<1x128xf32>
    %18 = arith.subf %3, %4 : vector<4x128xf32>
    %c0_8 = arith.constant 0 : index
    %c0_9 = arith.constant 0 : index
    %c0_10 = arith.constant 0 : index
    %19 = vector.load %arg4[%c0_8, %c0_9, %c0_10] : memref<1x1x128xf32, #tpu.memory_space<vmem>>, vector<1x1x128xf32>
    %20 = arith.mulf %18, %18 : vector<4x128xf32>
    %21 = vector.broadcast %17 : vector<1x128xf32> to vector<4x128xf32>
    %22 = arith.mulf %20, %21 : vector<4x128xf32>
    %23 = vector.shape_cast %22 : vector<4x128xf32> to vector<1x4x128xf32>
    %cst_11 = arith.constant dense<0.000000e+00> : vector<1xf32>
    %24 = vector.multi_reduction <add>, %23, %cst_11 [1, 2] : vector<1x4x128xf32> to vector<1xf32>
    %25 = vector.shape_cast %24 : vector<1xf32> to vector<1x1x1xf32>
    %26 = vector.extract %25[0, 0, 0] : f32 from vector<1x1x1xf32>
    %27 = vector.broadcast %26 : f32 to vector<1x1x128xf32>
    %28 = arith.addf %19, %27 : vector<1x1x128xf32>
    %c0_12 = arith.constant 0 : index
    %c0_13 = arith.constant 0 : index
    %c0_14 = arith.constant 0 : index
    %29 = vector.load %arg4[%c0_12, %c0_13, %c0_14] : memref<1x1x128xf32, #tpu.memory_space<vmem>>, vector<1x1x128xf32>
    tpu.vector_store %arg4[%c0_12, %c0_13, %c0_14], %28 {strides = array<i32>} : memref<1x1x128xf32, #tpu.memory_space<vmem>>, vector<1x1x128xf32>,
    return
  }
  func.func @transform_0(%arg0: i32, %arg1: i32) -> (i32, i32) {
    %c1_i32 = arith.constant 1 : i32
    %0 = arith.muli %arg0, %c1_i32 : i32
    %1 = arith.addi %0, %arg1 : i32
    %c0_i32 = arith.constant 0 : i32
    %c0_i32_0 = arith.constant 0 : i32
    return %c0_i32, %1 : i32, i32
  }
  func.func @transform_1(%arg0: i32, %arg1: i32) -> (i32, i32) {
    %c1_i32 = arith.constant 1 : i32
    %0 = arith.muli %arg0, %c1_i32 : i32
    %1 = arith.addi %0, %arg1 : i32
    %c0_i32 = arith.constant 0 : i32
    %c0_i32_0 = arith.constant 0 : i32
    return %c0_i32, %1 : i32, i32
  }
  func.func @transform_2(%arg0: i32, %arg1: i32) -> (i32, i32, i32) {
    %c0_i32 = arith.constant 0 : i32
    %c0_i32_0 = arith.constant 0 : i32
    %c0_i32_1 = arith.constant 0 : i32
    return %arg0, %c0_i32, %c0_i32_0 : i32, i32, i32
  }
}

</mosaic_0001>

<bundles_post_ra>
// kernel: tpu_custom_call.1
= control target key start
LH: loop header
LB: loop body
LE: loop exit
PB: predicated region body
PF: predicated region fallthrough
CT: control target
= control target key end

     0   :  { %7 = vsyncpa [#allocation3], 0  ;;  %s770_s0 = inlined_call_operand.hbm [shape: f32[4,256], index: 0, kind: input, shape index: {}]   ;;  %s771_s1 = inlined_call_operand.hbm [shape: f32[4,256], index: 1, kind: input, shape index: {}]   ;;  %s772_s2 = inlined_call_operand.hbm [shape: f32[2,1,128], index: 2, kind: output, shape index: {}]  }
   0x1   :  { %9 = vsyncpa [#allocation3 + $0x1], 0 }
   0x2   :  { %10 = vsyncpa [#allocation6], 0 }
   0x3   :  { %12 = vsyncpa [#allocation6 + $0x1], 0 }
   0x4   :  { %13 = vsyncpa [#allocation4], 0 }
   0x5   :  { %15 = vsyncpa [#allocation4 + $0x1], 0  ;;  %s608_s9 = smov 0   ;;  %s610_s10 = smov 0  }
   0x6   :  { %s612_s11 = smov 0   ;;  %s614_s12 = smov 0  }
   0x7   :  { %s616_s13 = smov 0   ;;  %s618_s14 = smov 0  }
   0x8 LB: > { %s363_s15 = sadd.s32 4294967295, %s587_s14   ;;  %s364_s16 = sadd.s32 4294967294, %s587_s14   ;;  %s587_s14 = sphi %s618_s14, %s21_s14   ;;  %s583_s13 = sphi %s616_s13, %s784_s13   ;;  %s579_s12 = sphi %s614_s12, %s783_s12   ;;  %s575_s11 = sphi %s612_s11, %s782_s11   ;;  %s571_s10 = sphi %s610_s10, %s781_s10   ;;  %s567_s9 = sphi %s608_s9, %s780_s9  }
   0x9   : > { %s33_s17 = sadd.s32 1, %s583_s13  ;;  %s42_s18 = sadd.s32 1, %s575_s11 }
   0xa   : > { %p35_p0 = scmp.ge.s32.totalorder %s33_s17, 2  ;;  %p49_p1 = scmp.ne.s32.totalorder %s575_s11, %s571_s10 }
   0xb   : > { %p50_p2 = scmp.eq.s32.totalorder %s587_s14, 0  ;;  %p55_p3 = scmp.ne.s32.totalorder %s571_s10, %s567_s9 }
   0xc   : > { %s786_s17 = smov (%p35_p0, %s33_s17), 0  ;;  %p56_p5 = scmp.eq.s32.totalorder %s363_s15, 0 }
   0xd   : > { %p649_p4 = por %p50_p2, %p49_p1  ;;  %s39_s20 = ssub.s32 %s583_s13, %s786_s17 }
   0xe   : > { %p107_p6 = scmp.eq.s32.totalorder %s363_s15, 1  ;;  %p40_p7 = scmp.eq.s32.totalorder %s39_s20, 0 }
   0xf   : > { %p655_p8 = por %p56_p5, %p55_p3  ;;  %p113_p10 = scmp.eq.s32.totalorder %s364_s16, 1 }
  0x10   : > { %p659_p9 = por %p107_p6, %p49_p1  ;;  %p396_p13 = scmp.lt.s32.totalorder %s587_s14, 2 }
  0x11   : > { %s664_s23 = scalar_select %p40_p7, %s575_s11, %s42_s18  }
  0x12   : > { %p666_p11 = por %p113_p10, %p55_p3  ;;  %s673_s25 = sand.u32 1, %s575_s11  }
  0x13   : > { %s367_s26 = sshll.u32 %s673_s25, 2  ;;  %s368_s27 = sshll.u32 %s583_s13, 6 }
  0x14   : > { %s143_s30 = scalar_lea.hbm %s770_s0, %s368_s27  ;;  %s137_s3 = scalar_lea.vmem [#allocation2], %s367_s26 }
  0x15   : > { %s145_s4 = sshll.u32 %s137_s3, 4  ;;  %p682_p0 = pnand %p396_p13, %p649_p4  ;;  %s146_s4 = int_to_ptr.vmem [resolvable:$true] %s145_s4 }
  0x16   : > { %p371_p1 = scmp.ge.s32.totalorder %s587_s14, 1  ;;  %p169_p2 = scmp.lt.s32.totalorder %s587_s14, 3 }
  0x17   : > { %s134_s6 = scalar_lea.sflag [#allocation3], %s673_s25  ;;  %p449_p3 = pneg %p682_p0 }
  0x18   : > { %s460_s7 = scalar_lea.vmem %s146_s4, 64  ;;  %s589_s8 = smov [#allocation2]  }
  0x19   : > { %p461_p5 = scmp.ne.s32.totalorder %s146_s4, %s460_s7  ;;  %s465_s15 = sshll.u32 %s589_s8, 4  ;;  %s466_s15 = int_to_ptr.vmem [resolvable:$false] %s465_s15 }
  0x1a   : > { %s467_s16 = scalar_lea.vmem %s466_s15, 128  ;;  %p468_p4 = scmp.lt.s32.totalorder %s146_s4, %s466_s15 }
  0x1b   : > { %p463_p6 = pnand %p461_p5, %p449_p3  ;;  %p469_p10 = scmp.lt.s32.totalorder %s467_s16, %s460_s7 }
  0x1d   : > { %p464_p7 = pneg %p463_p6  ;;  %p470_p13 = por %p469_p10, %p468_p4 }
  0x1f   : > { %p471_p12 = pnand %p470_p13, %p464_p7 }
  0x21   : > { %474 = shalt.err (!%p471_p12)
}
  0x22   : > { %388 = dma.hbm_to_vmem [thread:$0]  (!%p682_p0), %s143_s30, 64, %s146_s4, %s134_s6  }
  0x23   : > { %p700_p5 = pnand %p371_p1, %p169_p2  ;;  %s162_s28 = scalar_lea.hbm %s771_s1, %s368_s27 }
  0x24   : > { %s156_s29 = scalar_lea.vmem [#allocation5], %s367_s26  ;;  %s153_s7 = scalar_lea.sflag [#allocation6], %s673_s25 }
  0x25   : > { %s164_s3 = sshll.u32 %s156_s29, 4  ;;  %s590_s30 = smov [#allocation5]   ;;  %s165_s3 = int_to_ptr.vmem [resolvable:$true] %s164_s3 }
  0x26   : > { %s488_s8 = scalar_lea.vmem %s165_s3, 64  ;;  %s493_s4 = sshll.u32 %s590_s30, 4  ;;  %s494_s4 = int_to_ptr.vmem [resolvable:$false] %s493_s4 }
  0x27   : > { %p489_p12 = scmp.ne.s32.totalorder %s165_s3, %s488_s8  ;;  %s495_s6 = scalar_lea.vmem %s494_s4, 128 }
  0x28   : > { %p496_p1 = scmp.lt.s32.totalorder %s165_s3, %s494_s4  ;;  %p497_p2 = scmp.lt.s32.totalorder %s495_s6, %s488_s8 }
  0x29   : > { %p491_p6 = pnand %p489_p12, %p449_p3 }
  0x2a   : > { %p498_p4 = por %p497_p2, %p496_p1 }
  0x2b   : > { %p492_p7 = pneg %p491_p6 }
  0x2d   : > { %p499_p10 = pnand %p498_p4, %p492_p7 }
  0x2f   : > { %502 = shalt.err (!%p499_p10)
}
  0x30   : > { %391 = dma.hbm_to_vmem [thread:$0]  (!%p682_p0), %s162_s28, 64, %s165_s3, %s153_s7  }
  0x31   : > { %173 = sbr.rel (%p700_p5) target bundleno = 286 (0x11e), region = 28  ;;  %s716_s25 = sand.u32 (!%p700_p5), 1, %s571_s10  }
  0x32   : > { %s372_s26 = sshll.u32 (!%p700_p5), %s716_s25, 2  ;;  %s176_s27 = scalar_lea.sflag (!%p700_p5), [#allocation3], %s716_s25 }
  0x33   : > { %s179_s15 = scalar_lea.vmem (!%p700_p5), [#allocation2], %s372_s26 }
  0x36   : > { %554 = dma.done.wait (%p655_p8), %s176_s27, 64  }
  0x37   : > { %556 = vsyncadd (%p655_p8), %s176_s27, 4294967232  ;;  %s185_s5 = scalar_lea.sflag [#allocation6], %s716_s25  ;;  %s188_s16 = scalar_lea.vmem [#allocation5], %s372_s26 }
  0x38   : > { %558 = dma.done.wait (%p655_p8), %s185_s5, 64  }
  0x39   : > { %560 = vsyncadd (%p655_p8), %s185_s5, 4294967232  ;;  %v232_v0 = vlaneseq  ;;  %v220_v1 = vld [vmem:[%s179_s15] sm:$0xf]  ;;  %v221_v2 = vld [vmem:[%s188_s16] sm:$0xf]  ;;  %vm237_vm3 = vcmask 1043456  }
  0x3a   : > { %vm222_vm0 = vcmp.ge.f32.partialorder %v221_v2, 0.0  ;;  %vm223_vm1 = vcmp.lt.f32.partialorder %v221_v2, 1.0  ;;  %v225_v4 = vmul.f32 10.0, %v221_v2  ;;  %v229_v5 = vsub.f32 %v220_v1, %v221_v2  ;;  %s212_s21 = scalar_lea.vmem [#allocation7], %s716_s25  ;;  %s374_s18 = sshll.u32 %s579_s12, 4 }
  0x3b   : > { %v233_v3 = vshrl.u32 %v232_v0, 7  ;;  %vm224_vm2 = vmand %vm222_vm0, %vm223_vm1  ;;  %v591_v14 = vmov 0.0   ;;  %s264_s19 = sshll.u32 %s212_s21, 4  ;;  %s262_s3 = scalar_lea.hbm %s772_s2, %s374_s18  ;;  %s265_s19 = int_to_ptr.vmem [resolvable:$true] %s264_s19 }
  0x3c   : > { %v226_v6 = vfloor.f32 %v225_v4  ;;  %v231_v9 = vmul.f32 %v229_v5, %v229_v5  ;;  %219 = vst [vmem:[%s212_s21] sm:$0x1] %v591_v14  ;;  %s252_s7 = scalar_lea.sflag [#allocation4], %s716_s25  ;;  %s503_s8 = scalar_lea.vmem %s265_s19, 16 }
  0x3d   : > { %v234_v7 = vsub.s32 0, %v233_v3  ;;  %p504_p8 = scmp.ne.s32.totalorder %s265_s19, %s503_s8  ;;  %s592_s30 = smov [#allocation7]  }
  0x3e   : > { %v227_v8 = vadd.f32 1.0, %v226_v6  ;;  %s507_s4 = sshll.u32 %s592_s30, 4  ;;  %s508_s4 = int_to_ptr.vmem [resolvable:$false] %s507_s4 }
  0x3f   : > { %p505_p0 = pnand %p504_p8, %p659_p9  ;;  %s509_s12 = scalar_lea.vmem %s508_s4, 32 }
  0x40   : > { %v228_v10 = vsel %vm224_vm2, %v227_v8, 0.0  ;;  %p510_p13 = scmp.lt.s32.totalorder %s265_s19, %s508_s4  ;;  %p511_p5 = scmp.lt.s32.totalorder %s509_s12, %s503_s8 }
  0x41   : > { %v235_v11 = vrot.slane %v228_v10, %v234_v7  ;;  %p506_p3 = pneg %p505_p0 }
  0x42   : > { %p512_p12 = por %p511_p5, %p510_p13 }
  0x43   : > { %v236_v12 = vmul.f32 %v235_v11, %v231_v9  ;;  %v230_v22 = vld [vmem:[%s212_s21] sm:$0x1] }
  0x44   : > { %p513_p6 = pnand %p512_p12, %p506_p3 }
  0x45   : > { %v238_v13 = vsel %vm237_vm3, %v236_v12, 0.0 }
  0x46   : > { %239 = vadd.xlane.f32.xlu0 %v238_v13 }
  0xcf   : > { %v240_v15 = vpop.xlane.xlu0 %239 }
  0xd0   : > { %v241_v16 = vrot.slane %v240_v15, 4 }
  0xd2   : > { %v242_v17 = vadd.f32 %v241_v16, %v240_v15 }
  0xd4   : > { %v243_v18 = vrot.slane %v242_v17, 2 }
  0xd6   : > { %v244_v19 = vadd.f32 %v243_v18, %v242_v17 }
  0xd8   : > { %v245_v20 = vrot.slane %v244_v19, 1 }
  0xda   : > { %v246_v21 = vadd.f32 %v245_v20, %v244_v19 }
  0xdc   : > { %377 = vpush %v246_v21 }
 0x10d   : > { %s378_s20 = spop %377 }
 0x10e   : > { %v248_v23 = vstv %s378_s20 }
 0x10f   : > { %v249_v24 = vadd.f32 %v248_v23, %v230_v22 }
 0x111   : > { %250 = vst [vmem:[%s212_s21] sm:$0x1] %v249_v24 }
 0x112   : > { %516 = shalt.err (!%p513_p6)
}
 0x113   : > { %s517_s6 = scalar_lea.hbm %s262_s3, 16  ;;  %s521_s27 = scalar_lea.hbm %s772_s2, 32 }
 0x114   : > { %p518_p7 = scmp.ne.s32.totalorder %s262_s3, %s517_s6  ;;  %p522_p4 = scmp.lt.s32.totalorder %s262_s3, %s772_s2 }
 0x115   : > { %p523_p10 = scmp.lt.s32.totalorder %s521_s27, %s517_s6 }
 0x116   : > { %p519_p1 = pnand %p518_p7, %p659_p9 }
 0x117   : > { %p524_p8 = por %p523_p10, %p522_p4 }
 0x118   : > { %p520_p2 = pneg %p519_p1 }
 0x11a   : > { %p525_p0 = pnand %p524_p8, %p520_p2 }
 0x11c   : > { %528 = shalt.err (!%p525_p0)
}
 0x11d   : > { %383 = dma.vmem_to_hbm [thread:$0]  (%p659_p9), %s265_s19, 16, %s262_s3, %s252_s7  }
 0x11e PF: > { %s276_s16 = sand.u32 1, %s567_s9   ;;  %p779_p3 = scmp.ge.s32.totalorder %s587_s14, 2 }
 0x11f   : > { %s277_s21 = scalar_lea.sflag [#allocation4], %s276_s16 }
 0x120   : > { %p393_p13 = pnand %p779_p3, %p666_p11 }
 0x122   : > { %p394_p5 = pneg %p393_p13 }
 0x124   : > { %562 = dma.done.wait (%p394_p5), %s277_s21, 16  }
 0x125   : > { %564 = vsyncadd (%p394_p5), %s277_s21, 4294967280  ;;  %s21_s14 = sadd.s32 1, %s587_s14   ;;  %s780_s9 = smov %s571_s10 }
 0x126   : > { %p18_p12 = scmp.ge.s32.totalorder %s21_s14, 4   ;;  %s781_s10 = smov %s575_s11 }
 0x127   : > { %s782_s11 = smov %s664_s23  ;;  %s783_s12 = smov %s583_s13 }
 0x128   : > { %s784_s13 = smov %s786_s17  ;;  %20 = sbr.rel (!%p18_p12) target bundleno = 8 (0x8), region = 90 }
 0x12d   :  { %281 = vsyncpa [#allocation3], 1 }
 0x12e   :  { %283 = vsyncpa [#allocation3 + $0x1], 1 }
 0x12f   :  { %284 = vsyncpa [#allocation6], 1 }
 0x130   :  { %286 = vsyncpa [#allocation6 + $0x1], 1 }
 0x131   :  { %287 = vsyncpa [#allocation4], 1 }
 0x132   :  { %289 = vsyncpa [#allocation4 + $0x1], 1 }

</bundles_post_ra>
